<compile_context>
chip_gen: v6e
topology: v6e:2x2x1
jax: 0.10.0
libtpu: 0.0.40
codegen_flags: <defaults>
</compile_context>

<pallas_src>
import jax
import jax.numpy as jnp
import numpy as np
from jax.experimental import pallas as pl
from jax.experimental.pallas import tpu as pltpu


# ----------------------------- Pallas kernel --------------------------------

def _ltsm_fused_kernel(x_ref, w_ih_ref, w_hh_ref, b_ref, h0_ref, c0_ref,
                       w_lin_ref, b_lin_ref, y_ref, hN_ref, cN_ref, feats_ref):
    """Whole LSTM sequence + linear head in a single (grid-less) invocation.

    x_ref:       (B, T, I)   batch-major input (as PyTorch batch_first)
    w_ih_ref:    (I, 4H)     fused input->gate weights, gate order i, f, g, o
    w_hh_ref:    (H, 4H)     fused hidden->gate weights
    b_ref:       (1, 4H)     fused bias (b_ih + b_hh)
    h0_ref/c0_ref: (B, H)    initial states
    w_lin_ref:   (H, C), b_lin_ref: (1, C)   linear head
    y_ref:       (B*T, C)    head output, rows already in PyTorch order b*T + t
    hN_ref/cN_ref: (B, H)    final states
    feats_ref:   (B, T, H)   VMEM scratch holding all hidden states
    """
    B, T, I = x_ref.shape
    H = w_hh_ref.shape[0]

    # (1) Hoisted all-timestep input projection: one lane-dense MXU matmul.
    #     Rows stay batch-major; reshape (B,T,I)->(B*T,I) is tile-aligned (T=8).
    x_flat = x_ref[...].reshape(B * T, I)
    xg = (jnp.dot(x_flat, w_ih_ref[...], preferred_element_type=jnp.float32)
          + b_ref[...]).reshape(B, T, 4 * H)                  # (B, T, 4H)

    w_hh = w_hh_ref[...]
    h = h0_ref[...]
    c = c0_ref[...]

    # (2) Statically unrolled recurrence (T is a trace-time constant): full LLO
    #     scheduler visibility, no per-step grid/pipeline overhead.
    for t in range(T):
        g = xg[:, t, :] + jnp.dot(h, w_hh,
                                  preferred_element_type=jnp.float32)  # (B,4H)
        # Two full-vreg EUP pushes instead of four quarter-vreg ones.
        s = jax.nn.sigmoid(g)
        th = jnp.tanh(g)
        i_g = s[:, 0 * H:1 * H]
        f_g = s[:, 1 * H:2 * H]
        o_g = s[:, 3 * H:4 * H]
        g_g = th[:, 2 * H:3 * H]
        c = f_g * c + i_g * g_g
        h = o_g * jnp.tanh(c)
        feats_ref[:, t, :] = h          # off the h->h critical path

    hN_ref[...] = h
    cN_ref[...] = c

    # (3) Fused linear head: one (B*T, H) @ (H, C) matmul; output rows are
    #     already batch-major (b*T + t), matching PyTorch reshape(-1, H).
    feats = feats_ref[...].reshape(B * T, H)
    y_ref[...] = (jnp.dot(feats, w_lin_ref[...],
                          preferred_element_type=jnp.float32)
                  + b_lin_ref[...])


# ------------------------------ wrapper --------------------------------------

def lstm_model_forward(x, hidden_state, cell_state, params):
    """x: (B, T, I); hidden_state/cell_state: (1, B, H).  All float32."""
    B, T, I = x.shape
    H = params["w_hh"].shape[0]
    C = params["w_lin"].shape[1]

    x = x.astype(jnp.float32)
    h0 = hidden_state[0].astype(jnp.float32)                   # (B, H)
    c0 = cell_state[0].astype(jnp.float32)                     # (B, H)

    vmem = pltpu.MemorySpace.VMEM
    flops = int(2 * B * T * I * 4 * H        # input projection
                + 2 * T * B * H * 4 * H      # recurrent matmuls
                + 2 * B * T * H * C          # linear head
                + 12 * T * B * H)            # gate elementwise (approx)
    transcendentals = int(T * B * (8 * H + H))
    bytes_accessed = int(4 * (B * T * I + I * 4 * H + H * 4 * H + 4 * H
                              + 2 * B * H + H * C + C
                              + B * T * C + 2 * B * H))

    y, hN, cN = pl.pallas_call(
        _ltsm_fused_kernel,
        out_shape=(jax.ShapeDtypeStruct((B * T, C), jnp.float32),
                   jax.ShapeDtypeStruct((B, H), jnp.float32),
                   jax.ShapeDtypeStruct((B, H), jnp.float32)),
        in_specs=[pl.BlockSpec(memory_space=vmem)] * 8,
        out_specs=(pl.BlockSpec(memory_space=vmem),
                   pl.BlockSpec(memory_space=vmem),
                   pl.BlockSpec(memory_space=vmem)),
        scratch_shapes=[pltpu.VMEM((B, T, H), jnp.float32)],
        input_output_aliases={4: 1, 5: 2},   # h0 -> hN, c0 -> cN
        cost_estimate=pl.CostEstimate(flops=flops,
                                      transcendentals=transcendentals,
                                      bytes_accessed=bytes_accessed),
    )(x, params["w_ih"], params["w_hh"], params["b"], h0, c0,
      params["w_lin"], params["b_lin"])

    # y is already in PyTorch row order (b*T + t): no wrapper reorder needed.
    return y, (hN[None], cN[None])


def init_params(key, numb_categories, hidden_size):
    """Deterministic synthetic init, PyTorch-style U(-1/sqrt(H), 1/sqrt(H)).

    Fused-gate layout: w_ih (I, 4H), w_hh (H, 4H), b (1, 4H); gate order
    i, f, g, o.  (Real nn.LSTM checkpoints store (4H, I)/(4H, H) and must be
    transposed into this layout; b = b_ih + b_hh.)
    """
    H, I = hidden_size, numb_categories
    bound = 1.0 / np.sqrt(H)
    ks = jax.random.split(key, 6)
    u = lambda k, shape: jax.random.uniform(k, shape, jnp.float32, -bound, bound)
    w_ih = u(ks[0], (I, 4 * H))
    w_hh = u(ks[1], (H, 4 * H))
    b = u(ks[2], (1, 4 * H)) + u(ks[3], (1, 4 * H))   # b_ih + b_hh
    w_lin = u(ks[4], (H, I))
    b_lin = u(ks[5], (1, I))
    return dict(w_ih=w_ih, w_hh=w_hh, b=b, w_lin=w_lin, b_lin=b_lin)


def reference_forward(x, hidden_state, cell_state, params):
    """Pure-JAX reference of the PyTorch forward (correctness check only)."""
    B, T, I = x.shape
    H = params["w_hh"].shape[0]
    h = hidden_state[0]
    c = cell_state[0]
    outs = []
    for t in range(T):
        g = x[:, t, :] @ params["w_ih"] + h @ params["w_hh"] + params["b"]
        i_g = jax.nn.sigmoid(g[:, 0 * H:1 * H])
        f_g = jax.nn.sigmoid(g[:, 1 * H:2 * H])
        g_g = jnp.tanh(g[:, 2 * H:3 * H])
        o_g = jax.nn.sigmoid(g[:, 3 * H:4 * H])
        c = f_g * c + i_g * g_g
        h = o_g * jnp.tanh(c)
        outs.append(h)
    hs = jnp.stack(outs, axis=1)                       # (B, T, H)
    y = hs.reshape(-1, H) @ params["w_lin"] + params["b_lin"]
    return y, (h[None], c[None])


# -------------------------------- main ---------------------------------------

if __name__ == "__main__":
    numb_categories = 8
    hidden_size = 32       # 4H = 128 -> one full vreg lane width for the gates
    batch = 2
    seq = 8

    key = jax.random.PRNGKey(0)
    k_par, k_x = jax.random.split(key)
    params = init_params(k_par, numb_categories, hidden_size)

    x = jax.random.normal(k_x, (batch, seq, numb_categories), jnp.float32)
    # create_state_layer equivalent: zeros of (num_layers=1, B, H)
    h0 = jnp.zeros((1, batch, hidden_size), jnp.float32)
    c0 = jnp.zeros((1, batch, hidden_size), jnp.float32)

    y, (hN, cN) = lstm_model_forward(x, h0, c0, params)
    jax.block_until_ready((y, hN, cN))

    y_ref, (hN_ref, cN_ref) = reference_forward(x, h0, c0, params)

    assert y.shape == (batch * seq, numb_categories)
    assert hN.shape == (1, batch, hidden_size)
    assert cN.shape == (1, batch, hidden_size)
    # Tolerance accounts for MXU multi-pass f32 vs. XLA default dot precision.
    np.testing.assert_allclose(np.asarray(y), np.asarray(y_ref),
                               rtol=1e-4, atol=1e-4)
    np.testing.assert_allclose(np.asarray(hN), np.asarray(hN_ref),
                               rtol=1e-4, atol=1e-4)
    np.testing.assert_allclose(np.asarray(cN), np.asarray(cN_ref),
                               rtol=1e-4, atol=1e-4)

    print("KERNEL_OK")
</pallas_src>

<mosaic_0001>
module attributes {stable_mosaic.version = 11 : i64} {
  func.func @_ltsm_fused_kernel(%arg0: memref<2x8x8xf32, #tpu.memory_space<vmem>>, %arg1: memref<8x128xf32, #tpu.memory_space<vmem>>, %arg2: memref<32x128xf32, #tpu.memory_space<vmem>>, %arg3: memref<1x128xf32, #tpu.memory_space<vmem>>, %arg4: memref<2x32xf32, #tpu.memory_space<vmem>>, %arg5: memref<2x32xf32, #tpu.memory_space<vmem>>, %arg6: memref<32x8xf32, #tpu.memory_space<vmem>>, %arg7: memref<1x8xf32, #tpu.memory_space<vmem>>, %arg8: memref<16x8xf32, #tpu.memory_space<vmem>>, %arg9: memref<2x32xf32, #tpu.memory_space<vmem>>, %arg10: memref<2x32xf32, #tpu.memory_space<vmem>>, %arg11: memref<2x8x32xf32, #tpu.memory_space<vmem>>) attributes {dimension_semantics = [], scalar_prefetch = 0 : i64, scratch_operands = 1 : i64, tpu.core_type = #tpu.core_type<tc>} {
    %c0 = arith.constant 0 : index
    %c0_0 = arith.constant 0 : index
    %c0_1 = arith.constant 0 : index
    %0 = vector.load %arg0[%c0, %c0_0, %c0_1] : memref<2x8x8xf32, #tpu.memory_space<vmem>>, vector<2x8x8xf32>
    %1 = vector.shape_cast %0 : vector<2x8x8xf32> to vector<16x8xf32>
    %c0_2 = arith.constant 0 : index
    %c0_3 = arith.constant 0 : index
    %2 = vector.load %arg1[%c0_2, %c0_3] : memref<8x128xf32, #tpu.memory_space<vmem>>, vector<8x128xf32>
    %cst = arith.constant dense<0.000000e+00> : vector<16x128xf32>
    %3 = tpu.matmul %1, %2, %cst {dimension_numbers = #tpu.dot_dimension_numbers<[1], [0], [0], [1], [0, 0, 1, 1], [], []>} : vector<16x8xf32>, vector<8x128xf32>, vector<16x128xf32> -> vector<16x128xf32>
    %c0_4 = arith.constant 0 : index
    %c0_5 = arith.constant 0 : index
    %4 = vector.load %arg3[%c0_4, %c0_5] : memref<1x128xf32, #tpu.memory_space<vmem>>, vector<1x128xf32>
    %5 = vector.broadcast %4 : vector<1x128xf32> to vector<16x128xf32>
    %6 = arith.addf %3, %5 : vector<16x128xf32>
    %7 = vector.shape_cast %6 : vector<16x128xf32> to vector<2x8x128xf32>
    %c0_6 = arith.constant 0 : index
    %c0_7 = arith.constant 0 : index
    %8 = vector.load %arg2[%c0_6, %c0_7] : memref<32x128xf32, #tpu.memory_space<vmem>>, vector<32x128xf32>
    %c0_8 = arith.constant 0 : index
    %c0_9 = arith.constant 0 : index
    %9 = vector.load %arg4[%c0_8, %c0_9] : memref<2x32xf32, #tpu.memory_space<vmem>>, vector<2x32xf32>
    %c0_10 = arith.constant 0 : index
    %c0_11 = arith.constant 0 : index
    %10 = vector.load %arg5[%c0_10, %c0_11] : memref<2x32xf32, #tpu.memory_space<vmem>>, vector<2x32xf32>
    %11 = vector.extract_strided_slice %7 {offsets = [0, 0, 0], sizes = [2, 1, 128], strides = [1, 1, 1]} : vector<2x8x128xf32> to vector<2x1x128xf32>
    %12 = vector.shape_cast %11 : vector<2x1x128xf32> to vector<2x128xf32>
    %cst_12 = arith.constant dense<0.000000e+00> : vector<2x128xf32>
    %13 = tpu.matmul %9, %8, %cst_12 {dimension_numbers = #tpu.dot_dimension_numbers<[1], [0], [0], [1], [0, 0, 1, 1], [], []>} : vector<2x32xf32>, vector<32x128xf32>, vector<2x128xf32> -> vector<2x128xf32>
    %14 = arith.addf %12, %13 : vector<2x128xf32>
    %15 = arith.negf %14 : vector<2x128xf32>
    %16 = math.exp %15 : vector<2x128xf32>
    %cst_13 = arith.constant 1.000000e+00 : f32
    %17 = vector.broadcast %cst_13 : f32 to vector<2x128xf32>
    %18 = arith.addf %17, %16 : vector<2x128xf32>
    %19 = arith.divf %17, %18 : vector<2x128xf32>
    %20 = math.tanh %14 : vector<2x128xf32>
    %21 = vector.extract_strided_slice %19 {offsets = [0, 0], sizes = [2, 32], strides = [1, 1]} : vector<2x128xf32> to vector<2x32xf32>
    %22 = vector.extract_strided_slice %19 {offsets = [0, 32], sizes = [2, 32], strides = [1, 1]} : vector<2x128xf32> to vector<2x32xf32>
    %23 = vector.extract_strided_slice %19 {offsets = [0, 96], sizes = [2, 32], strides = [1, 1]} : vector<2x128xf32> to vector<2x32xf32>
    %24 = vector.extract_strided_slice %20 {offsets = [0, 64], sizes = [2, 32], strides = [1, 1]} : vector<2x128xf32> to vector<2x32xf32>
    %25 = arith.mulf %22, %10 : vector<2x32xf32>
    %26 = arith.mulf %21, %24 : vector<2x32xf32>
    %27 = arith.addf %25, %26 : vector<2x32xf32>
    %28 = math.tanh %27 : vector<2x32xf32>
    %29 = arith.mulf %23, %28 : vector<2x32xf32>
    %c0_14 = arith.constant 0 : index
    %c0_15 = arith.constant 0 : index
    %c0_16 = arith.constant 0 : index
    %30 = vector.load %arg11[%c0_14, %c0_15, %c0_16] : memref<2x8x32xf32, #tpu.memory_space<vmem>>, vector<2x1x32xf32>
    %31 = vector.shape_cast %30 : vector<2x1x32xf32> to vector<2x32xf32>
    %32 = vector.shape_cast %29 : vector<2x32xf32> to vector<2x1x32xf32>
    tpu.vector_store %arg11[%c0_14, %c0_15, %c0_16], %32 {strides = array<i32>} : memref<2x8x32xf32, #tpu.memory_space<vmem>>, vector<2x1x32xf32>,
    %33 = vector.extract_strided_slice %7 {offsets = [0, 1, 0], sizes = [2, 1, 128], strides = [1, 1, 1]} : vector<2x8x128xf32> to vector<2x1x128xf32>
    %34 = vector.shape_cast %33 : vector<2x1x128xf32> to vector<2x128xf32>
    %cst_17 = arith.constant dense<0.000000e+00> : vector<2x128xf32>
    %35 = tpu.matmul %29, %8, %cst_17 {dimension_numbers = #tpu.dot_dimension_numbers<[1], [0], [0], [1], [0, 0, 1, 1], [], []>} : vector<2x32xf32>, vector<32x128xf32>, vector<2x128xf32> -> vector<2x128xf32>
    %36 = arith.addf %34, %35 : vector<2x128xf32>
    %37 = arith.negf %36 : vector<2x128xf32>
    %38 = math.exp %37 : vector<2x128xf32>
    %cst_18 = arith.constant 1.000000e+00 : f32
    %39 = vector.broadcast %cst_18 : f32 to vector<2x128xf32>
    %40 = arith.addf %39, %38 : vector<2x128xf32>
    %41 = arith.divf %39, %40 : vector<2x128xf32>
    %42 = math.tanh %36 : vector<2x128xf32>
    %43 = vector.extract_strided_slice %41 {offsets = [0, 0], sizes = [2, 32], strides = [1, 1]} : vector<2x128xf32> to vector<2x32xf32>
    %44 = vector.extract_strided_slice %41 {offsets = [0, 32], sizes = [2, 32], strides = [1, 1]} : vector<2x128xf32> to vector<2x32xf32>
    %45 = vector.extract_strided_slice %41 {offsets = [0, 96], sizes = [2, 32], strides = [1, 1]} : vector<2x128xf32> to vector<2x32xf32>
    %46 = vector.extract_strided_slice %42 {offsets = [0, 64], sizes = [2, 32], strides = [1, 1]} : vector<2x128xf32> to vector<2x32xf32>
    %47 = arith.mulf %44, %27 : vector<2x32xf32>
    %48 = arith.mulf %43, %46 : vector<2x32xf32>
    %49 = arith.addf %47, %48 : vector<2x32xf32>
    %50 = math.tanh %49 : vector<2x32xf32>
    %51 = arith.mulf %45, %50 : vector<2x32xf32>
    %c0_19 = arith.constant 0 : index
    %c1 = arith.constant 1 : index
    %c0_20 = arith.constant 0 : index
    %52 = vector.load %arg11[%c0_19, %c1, %c0_20] : memref<2x8x32xf32, #tpu.memory_space<vmem>>, vector<2x1x32xf32>
    %53 = vector.shape_cast %52 : vector<2x1x32xf32> to vector<2x32xf32>
    %54 = vector.shape_cast %51 : vector<2x32xf32> to vector<2x1x32xf32>
    tpu.vector_store %arg11[%c0_19, %c1, %c0_20], %54 {strides = array<i32>} : memref<2x8x32xf32, #tpu.memory_space<vmem>>, vector<2x1x32xf32>,
    %55 = vector.extract_strided_slice %7 {offsets = [0, 2, 0], sizes = [2, 1, 128], strides = [1, 1, 1]} : vector<2x8x128xf32> to vector<2x1x128xf32>
    %56 = vector.shape_cast %55 : vector<2x1x128xf32> to vector<2x128xf32>
    %cst_21 = arith.constant dense<0.000000e+00> : vector<2x128xf32>
    %57 = tpu.matmul %51, %8, %cst_21 {dimension_numbers = #tpu.dot_dimension_numbers<[1], [0], [0], [1], [0, 0, 1, 1], [], []>} : vector<2x32xf32>, vector<32x128xf32>, vector<2x128xf32> -> vector<2x128xf32>
    %58 = arith.addf %56, %57 : vector<2x128xf32>
    %59 = arith.negf %58 : vector<2x128xf32>
    %60 = math.exp %59 : vector<2x128xf32>
    %cst_22 = arith.constant 1.000000e+00 : f32
    %61 = vector.broadcast %cst_22 : f32 to vector<2x128xf32>
    %62 = arith.addf %61, %60 : vector<2x128xf32>
    %63 = arith.divf %61, %62 : vector<2x128xf32>
    %64 = math.tanh %58 : vector<2x128xf32>
    %65 = vector.extract_strided_slice %63 {offsets = [0, 0], sizes = [2, 32], strides = [1, 1]} : vector<2x128xf32> to vector<2x32xf32>
    %66 = vector.extract_strided_slice %63 {offsets = [0, 32], sizes = [2, 32], strides = [1, 1]} : vector<2x128xf32> to vector<2x32xf32>
    %67 = vector.extract_strided_slice %63 {offsets = [0, 96], sizes = [2, 32], strides = [1, 1]} : vector<2x128xf32> to vector<2x32xf32>
    %68 = vector.extract_strided_slice %64 {offsets = [0, 64], sizes = [2, 32], strides = [1, 1]} : vector<2x128xf32> to vector<2x32xf32>
    %69 = arith.mulf %66, %49 : vector<2x32xf32>
    %70 = arith.mulf %65, %68 : vector<2x32xf32>
    %71 = arith.addf %69, %70 : vector<2x32xf32>
    %72 = math.tanh %71 : vector<2x32xf32>
    %73 = arith.mulf %67, %72 : vector<2x32xf32>
    %c0_23 = arith.constant 0 : index
    %c2 = arith.constant 2 : index
    %c0_24 = arith.constant 0 : index
    %74 = vector.load %arg11[%c0_23, %c2, %c0_24] : memref<2x8x32xf32, #tpu.memory_space<vmem>>, vector<2x1x32xf32>
    %75 = vector.shape_cast %74 : vector<2x1x32xf32> to vector<2x32xf32>
    %76 = vector.shape_cast %73 : vector<2x32xf32> to vector<2x1x32xf32>
    tpu.vector_store %arg11[%c0_23, %c2, %c0_24], %76 {strides = array<i32>} : memref<2x8x32xf32, #tpu.memory_space<vmem>>, vector<2x1x32xf32>,
    %77 = vector.extract_strided_slice %7 {offsets = [0, 3, 0], sizes = [2, 1, 128], strides = [1, 1, 1]} : vector<2x8x128xf32> to vector<2x1x128xf32>
    %78 = vector.shape_cast %77 : vector<2x1x128xf32> to vector<2x128xf32>
    %cst_25 = arith.constant dense<0.000000e+00> : vector<2x128xf32>
    %79 = tpu.matmul %73, %8, %cst_25 {dimension_numbers = #tpu.dot_dimension_numbers<[1], [0], [0], [1], [0, 0, 1, 1], [], []>} : vector<2x32xf32>, vector<32x128xf32>, vector<2x128xf32> -> vector<2x128xf32>
    %80 = arith.addf %78, %79 : vector<2x128xf32>
    %81 = arith.negf %80 : vector<2x128xf32>
    %82 = math.exp %81 : vector<2x128xf32>
    %cst_26 = arith.constant 1.000000e+00 : f32
    %83 = vector.broadcast %cst_26 : f32 to vector<2x128xf32>
    %84 = arith.addf %83, %82 : vector<2x128xf32>
    %85 = arith.divf %83, %84 : vector<2x128xf32>
    %86 = math.tanh %80 : vector<2x128xf32>
    %87 = vector.extract_strided_slice %85 {offsets = [0, 0], sizes = [2, 32], strides = [1, 1]} : vector<2x128xf32> to vector<2x32xf32>
    %88 = vector.extract_strided_slice %85 {offsets = [0, 32], sizes = [2, 32], strides = [1, 1]} : vector<2x128xf32> to vector<2x32xf32>
    %89 = vector.extract_strided_slice %85 {offsets = [0, 96], sizes = [2, 32], strides = [1, 1]} : vector<2x128xf32> to vector<2x32xf32>
    %90 = vector.extract_strided_slice %86 {offsets = [0, 64], sizes = [2, 32], strides = [1, 1]} : vector<2x128xf32> to vector<2x32xf32>
    %91 = arith.mulf %88, %71 : vector<2x32xf32>
    %92 = arith.mulf %87, %90 : vector<2x32xf32>
    %93 = arith.addf %91, %92 : vector<2x32xf32>
    %94 = math.tanh %93 : vector<2x32xf32>
    %95 = arith.mulf %89, %94 : vector<2x32xf32>
    %c0_27 = arith.constant 0 : index
    %c3 = arith.constant 3 : index
    %c0_28 = arith.constant 0 : index
    %96 = vector.load %arg11[%c0_27, %c3, %c0_28] : memref<2x8x32xf32, #tpu.memory_space<vmem>>, vector<2x1x32xf32>
    %97 = vector.shape_cast %96 : vector<2x1x32xf32> to vector<2x32xf32>
    %98 = vector.shape_cast %95 : vector<2x32xf32> to vector<2x1x32xf32>
    tpu.vector_store %arg11[%c0_27, %c3, %c0_28], %98 {strides = array<i32>} : memref<2x8x32xf32, #tpu.memory_space<vmem>>, vector<2x1x32xf32>,
    %99 = vector.extract_strided_slice %7 {offsets = [0, 4, 0], sizes = [2, 1, 128], strides = [1, 1, 1]} : vector<2x8x128xf32> to vector<2x1x128xf32>
    %100 = vector.shape_cast %99 : vector<2x1x128xf32> to vector<2x128xf32>
    %cst_29 = arith.constant dense<0.000000e+00> : vector<2x128xf32>
    %101 = tpu.matmul %95, %8, %cst_29 {dimension_numbers = #tpu.dot_dimension_numbers<[1], [0], [0], [1], [0, 0, 1, 1], [], []>} : vector<2x32xf32>, vector<32x128xf32>, vector<2x128xf32> -> vector<2x128xf32>
    %102 = arith.addf %100, %101 : vector<2x128xf32>
    %103 = arith.negf %102 : vector<2x128xf32>
    %104 = math.exp %103 : vector<2x128xf32>
    %cst_30 = arith.constant 1.000000e+00 : f32
    %105 = vector.broadcast %cst_30 : f32 to vector<2x128xf32>
    %106 = arith.addf %105, %104 : vector<2x128xf32>
    %107 = arith.divf %105, %106 : vector<2x128xf32>
    %108 = math.tanh %102 : vector<2x128xf32>
    %109 = vector.extract_strided_slice %107 {offsets = [0, 0], sizes = [2, 32], strides = [1, 1]} : vector<2x128xf32> to vector<2x32xf32>
    %110 = vector.extract_strided_slice %107 {offsets = [0, 32], sizes = [2, 32], strides = [1, 1]} : vector<2x128xf32> to vector<2x32xf32>
    %111 = vector.extract_strided_slice %107 {offsets = [0, 96], sizes = [2, 32], strides = [1, 1]} : vector<2x128xf32> to vector<2x32xf32>
    %112 = vector.extract_strided_slice %108 {offsets = [0, 64], sizes = [2, 32], strides = [1, 1]} : vector<2x128xf32> to vector<2x32xf32>
    %113 = arith.mulf %110, %93 : vector<2x32xf32>
    %114 = arith.mulf %109, %112 : vector<2x32xf32>
    %115 = arith.addf %113, %114 : vector<2x32xf32>
    %116 = math.tanh %115 : vector<2x32xf32>
    %117 = arith.mulf %111, %116 : vector<2x32xf32>
    %c0_31 = arith.constant 0 : index
    %c4 = arith.constant 4 : index
    %c0_32 = arith.constant 0 : index
    %118 = vector.load %arg11[%c0_31, %c4, %c0_32] : memref<2x8x32xf32, #tpu.memory_space<vmem>>, vector<2x1x32xf32>
    %119 = vector.shape_cast %118 : vector<2x1x32xf32> to vector<2x32xf32>
    %120 = vector.shape_cast %117 : vector<2x32xf32> to vector<2x1x32xf32>
    tpu.vector_store %arg11[%c0_31, %c4, %c0_32], %120 {strides = array<i32>} : memref<2x8x32xf32, #tpu.memory_space<vmem>>, vector<2x1x32xf32>,
    %121 = vector.extract_strided_slice %7 {offsets = [0, 5, 0], sizes = [2, 1, 128], strides = [1, 1, 1]} : vector<2x8x128xf32> to vector<2x1x128xf32>
    %122 = vector.shape_cast %121 : vector<2x1x128xf32> to vector<2x128xf32>
    %cst_33 = arith.constant dense<0.000000e+00> : vector<2x128xf32>
    %123 = tpu.matmul %117, %8, %cst_33 {dimension_numbers = #tpu.dot_dimension_numbers<[1], [0], [0], [1], [0, 0, 1, 1], [], []>} : vector<2x32xf32>, vector<32x128xf32>, vector<2x128xf32> -> vector<2x128xf32>
    %124 = arith.addf %122, %123 : vector<2x128xf32>
    %125 = arith.negf %124 : vector<2x128xf32>
    %126 = math.exp %125 : vector<2x128xf32>
    %cst_34 = arith.constant 1.000000e+00 : f32
    %127 = vector.broadcast %cst_34 : f32 to vector<2x128xf32>
    %128 = arith.addf %127, %126 : vector<2x128xf32>
    %129 = arith.divf %127, %128 : vector<2x128xf32>
    %130 = math.tanh %124 : vector<2x128xf32>
    %131 = vector.extract_strided_slice %129 {offsets = [0, 0], sizes = [2, 32], strides = [1, 1]} : vector<2x128xf32> to vector<2x32xf32>
    %132 = vector.extract_strided_slice %129 {offsets = [0, 32], sizes = [2, 32], strides = [1, 1]} : vector<2x128xf32> to vector<2x32xf32>
    %133 = vector.extract_strided_slice %129 {offsets = [0, 96], sizes = [2, 32], strides = [1, 1]} : vector<2x128xf32> to vector<2x32xf32>
    %134 = vector.extract_strided_slice %130 {offsets = [0, 64], sizes = [2, 32], strides = [1, 1]} : vector<2x128xf32> to vector<2x32xf32>
    %135 = arith.mulf %132, %115 : vector<2x32xf32>
    %136 = arith.mulf %131, %134 : vector<2x32xf32>
    %137 = arith.addf %135, %136 : vector<2x32xf32>
    %138 = math.tanh %137 : vector<2x32xf32>
    %139 = arith.mulf %133, %138 : vector<2x32xf32>
    %c0_35 = arith.constant 0 : index
    %c5 = arith.constant 5 : index
    %c0_36 = arith.constant 0 : index
    %140 = vector.load %arg11[%c0_35, %c5, %c0_36] : memref<2x8x32xf32, #tpu.memory_space<vmem>>, vector<2x1x32xf32>
    %141 = vector.shape_cast %140 : vector<2x1x32xf32> to vector<2x32xf32>
    %142 = vector.shape_cast %139 : vector<2x32xf32> to vector<2x1x32xf32>
    tpu.vector_store %arg11[%c0_35, %c5, %c0_36], %142 {strides = array<i32>} : memref<2x8x32xf32, #tpu.memory_space<vmem>>, vector<2x1x32xf32>,
    %143 = vector.extract_strided_slice %7 {offsets = [0, 6, 0], sizes = [2, 1, 128], strides = [1, 1, 1]} : vector<2x8x128xf32> to vector<2x1x128xf32>
    %144 = vector.shape_cast %143 : vector<2x1x128xf32> to vector<2x128xf32>
    %cst_37 = arith.constant dense<0.000000e+00> : vector<2x128xf32>
    %145 = tpu.matmul %139, %8, %cst_37 {dimension_numbers = #tpu.dot_dimension_numbers<[1], [0], [0], [1], [0, 0, 1, 1], [], []>} : vector<2x32xf32>, vector<32x128xf32>, vector<2x128xf32> -> vector<2x128xf32>
    %146 = arith.addf %144, %145 : vector<2x128xf32>
    %147 = arith.negf %146 : vector<2x128xf32>
    %148 = math.exp %147 : vector<2x128xf32>
    %cst_38 = arith.constant 1.000000e+00 : f32
    %149 = vector.broadcast %cst_38 : f32 to vector<2x128xf32>
    %150 = arith.addf %149, %148 : vector<2x128xf32>
    %151 = arith.divf %149, %150 : vector<2x128xf32>
    %152 = math.tanh %146 : vector<2x128xf32>
    %153 = vector.extract_strided_slice %151 {offsets = [0, 0], sizes = [2, 32], strides = [1, 1]} : vector<2x128xf32> to vector<2x32xf32>
    %154 = vector.extract_strided_slice %151 {offsets = [0, 32], sizes = [2, 32], strides = [1, 1]} : vector<2x128xf32> to vector<2x32xf32>
    %155 = vector.extract_strided_slice %151 {offsets = [0, 96], sizes = [2, 32], strides = [1, 1]} : vector<2x128xf32> to vector<2x32xf32>
    %156 = vector.extract_strided_slice %152 {offsets = [0, 64], sizes = [2, 32], strides = [1, 1]} : vector<2x128xf32> to vector<2x32xf32>
    %157 = arith.mulf %154, %137 : vector<2x32xf32>
    %158 = arith.mulf %153, %156 : vector<2x32xf32>
    %159 = arith.addf %157, %158 : vector<2x32xf32>
    %160 = math.tanh %159 : vector<2x32xf32>
    %161 = arith.mulf %155, %160 : vector<2x32xf32>
    %c0_39 = arith.constant 0 : index
    %c6 = arith.constant 6 : index
    %c0_40 = arith.constant 0 : index
    %162 = vector.load %arg11[%c0_39, %c6, %c0_40] : memref<2x8x32xf32, #tpu.memory_space<vmem>>, vector<2x1x32xf32>
    %163 = vector.shape_cast %162 : vector<2x1x32xf32> to vector<2x32xf32>
    %164 = vector.shape_cast %161 : vector<2x32xf32> to vector<2x1x32xf32>
    tpu.vector_store %arg11[%c0_39, %c6, %c0_40], %164 {strides = array<i32>} : memref<2x8x32xf32, #tpu.memory_space<vmem>>, vector<2x1x32xf32>,
    %165 = vector.extract_strided_slice %7 {offsets = [0, 7, 0], sizes = [2, 1, 128], strides = [1, 1, 1]} : vector<2x8x128xf32> to vector<2x1x128xf32>
    %166 = vector.shape_cast %165 : vector<2x1x128xf32> to vector<2x128xf32>
    %cst_41 = arith.constant dense<0.000000e+00> : vector<2x128xf32>
    %167 = tpu.matmul %161, %8, %cst_41 {dimension_numbers = #tpu.dot_dimension_numbers<[1], [0], [0], [1], [0, 0, 1, 1], [], []>} : vector<2x32xf32>, vector<32x128xf32>, vector<2x128xf32> -> vector<2x128xf32>
    %168 = arith.addf %166, %167 : vector<2x128xf32>
    %169 = arith.negf %168 : vector<2x128xf32>
    %170 = math.exp %169 : vector<2x128xf32>
    %cst_42 = arith.constant 1.000000e+00 : f32
    %171 = vector.broadcast %cst_42 : f32 to vector<2x128xf32>
    %172 = arith.addf %171, %170 : vector<2x128xf32>
    %173 = arith.divf %171, %172 : vector<2x128xf32>
    %174 = math.tanh %168 : vector<2x128xf32>
    %175 = vector.extract_strided_slice %173 {offsets = [0, 0], sizes = [2, 32], strides = [1, 1]} : vector<2x128xf32> to vector<2x32xf32>
    %176 = vector.extract_strided_slice %173 {offsets = [0, 32], sizes = [2, 32], strides = [1, 1]} : vector<2x128xf32> to vector<2x32xf32>
    %177 = vector.extract_strided_slice %173 {offsets = [0, 96], sizes = [2, 32], strides = [1, 1]} : vector<2x128xf32> to vector<2x32xf32>
    %178 = vector.extract_strided_slice %174 {offsets = [0, 64], sizes = [2, 32], strides = [1, 1]} : vector<2x128xf32> to vector<2x32xf32>
    %179 = arith.mulf %176, %159 : vector<2x32xf32>
    %180 = arith.mulf %175, %178 : vector<2x32xf32>
    %181 = arith.addf %179, %180 : vector<2x32xf32>
    %182 = math.tanh %181 : vector<2x32xf32>
    %183 = arith.mulf %177, %182 : vector<2x32xf32>
    %c0_43 = arith.constant 0 : index
    %c7 = arith.constant 7 : index
    %c0_44 = arith.constant 0 : index
    %184 = vector.load %arg11[%c0_43, %c7, %c0_44] : memref<2x8x32xf32, #tpu.memory_space<vmem>>, vector<2x1x32xf32>
    %185 = vector.shape_cast %184 : vector<2x1x32xf32> to vector<2x32xf32>
    %186 = vector.shape_cast %183 : vector<2x32xf32> to vector<2x1x32xf32>
    tpu.vector_store %arg11[%c0_43, %c7, %c0_44], %186 {strides = array<i32>} : memref<2x8x32xf32, #tpu.memory_space<vmem>>, vector<2x1x32xf32>,
    %c0_45 = arith.constant 0 : index
    %c0_46 = arith.constant 0 : index
    %187 = vector.load %arg9[%c0_45, %c0_46] : memref<2x32xf32, #tpu.memory_space<vmem>>, vector<2x32xf32>
    tpu.vector_store %arg9[%c0_45, %c0_46], %183 {strides = array<i32>} : memref<2x32xf32, #tpu.memory_space<vmem>>, vector<2x32xf32>,
    %c0_47 = arith.constant 0 : index
    %c0_48 = arith.constant 0 : index
    %188 = vector.load %arg10[%c0_47, %c0_48] : memref<2x32xf32, #tpu.memory_space<vmem>>, vector<2x32xf32>
    tpu.vector_store %arg10[%c0_47, %c0_48], %181 {strides = array<i32>} : memref<2x32xf32, #tpu.memory_space<vmem>>, vector<2x32xf32>,
    %c0_49 = arith.constant 0 : index
    %c0_50 = arith.constant 0 : index
    %c0_51 = arith.constant 0 : index
    %189 = vector.load %arg11[%c0_49, %c0_50, %c0_51] : memref<2x8x32xf32, #tpu.memory_space<vmem>>, vector<2x8x32xf32>
    %190 = vector.shape_cast %189 : vector<2x8x32xf32> to vector<16x32xf32>
    %c0_52 = arith.constant 0 : index
    %c0_53 = arith.constant 0 : index
    %191 = vector.load %arg6[%c0_52, %c0_53] : memref<32x8xf32, #tpu.memory_space<vmem>>, vector<32x8xf32>
    %cst_54 = arith.constant dense<0.000000e+00> : vector<16x8xf32>
    %192 = tpu.matmul %190, %191, %cst_54 {dimension_numbers = #tpu.dot_dimension_numbers<[1], [0], [0], [1], [0, 0, 1, 1], [], []>} : vector<16x32xf32>, vector<32x8xf32>, vector<16x8xf32> -> vector<16x8xf32>
    %c0_55 = arith.constant 0 : index
    %c0_56 = arith.constant 0 : index
    %193 = vector.load %arg7[%c0_55, %c0_56] : memref<1x8xf32, #tpu.memory_space<vmem>>, vector<1x8xf32>
    %194 = vector.broadcast %193 : vector<1x8xf32> to vector<16x8xf32>
    %195 = arith.addf %192, %194 : vector<16x8xf32>
    %c0_57 = arith.constant 0 : index
    %c0_58 = arith.constant 0 : index
    %196 = vector.load %arg8[%c0_57, %c0_58] : memref<16x8xf32, #tpu.memory_space<vmem>>, vector<16x8xf32>
    tpu.vector_store %arg8[%c0_57, %c0_58], %195 {strides = array<i32>} : memref<16x8xf32, #tpu.memory_space<vmem>>, vector<16x8xf32>,
    return
  }
}

</mosaic_0001>

<bundles_post_ra>
// kernel: tpu_custom_call.1
= control target key start
LH: loop header
LB: loop body
LE: loop exit
PB: predicated region body
PF: predicated region fallthrough
CT: control target
= control target key end

     0   :  { %16 = vsyncpa [#allocation4], 0  ;;  %s1795_s13 = smov [#allocation3]   ;;  %s2190_s0 = inlined_call_operand.vmem [shape: f32[2,8,8], index: 0, kind: input, shape index: {}]   ;;  %s2191_s1 = inlined_call_operand.hbm [shape: f32[8,128], index: 1, kind: input, shape index: {}]   ;;  %s2192_s2 = inlined_call_operand.vmem [shape: f32[32,128], index: 2, kind: input, shape index: {}]   ;;  %s2193_s3 = inlined_call_operand.vmem [shape: f32[1,128], index: 3, kind: input, shape index: {}]   ;;  %s2194_s4 = inlined_call_operand.vmem [shape: f32[2,32], index: 4, kind: input, shape index: {}, may-alias: {4,9}]   ;;  %s2195_s5 = inlined_call_operand.vmem [shape: f32[2,32], index: 5, kind: input, shape index: {}, may-alias: {5,10}]   ;;  %s2196_s6 = inlined_call_operand.vmem [shape: f32[32,8], index: 6, kind: input, shape index: {}]   ;;  %s2197_s7 = inlined_call_operand.vmem [shape: f32[1,8], index: 7, kind: input, shape index: {}]   ;;  %s2198_s8 = inlined_call_operand.vmem [shape: f32[16,8], index: 8, kind: output, shape index: {0}]   ;;  %s2199_s9 = inlined_call_operand.vmem [shape: f32[2,32], index: 9, kind: output, shape index: {1}, may-alias: {4,9}]   ;;  %s2200_s10 = inlined_call_operand.vmem [shape: f32[2,32], index: 10, kind: output, shape index: {2}, may-alias: {5,10}]  }
   0x1   :  { %s25_s14 = sshll.u32 %s1795_s13, 4  ;;  %s26_s14 = int_to_ptr.vmem [resolvable:$true] %s25_s14 }
   0x2   :  { %s1781_s15 = scalar_lea.vmem %s26_s14, 128  ;;  %p1786_p1 = scmp.lt.s32.totalorder %s26_s14, %s26_s14 }
   0x3   :  { %p1782_p0 = scmp.ne.s32.totalorder %s26_s14, %s1781_s15  ;;  %p1787_p2 = scmp.lt.s32.totalorder %s1781_s15, %s1781_s15 }
   0x5   :  { %p1788_p3 = por %p1787_p2, %p1786_p1 }
   0x7   :  { %p1789_p4 = pnand %p1788_p3, %p1782_p0 }
   0x9   :  { %1792 = shalt.err (!%p1789_p4)
}
   0xa   :  { %28 = dma.hbm_to_vmem [thread:$0]  %s2191_s1, 128, %s26_s14, [#allocation4]  }
   0xb   :  { %1793 = dma.done.wait [#allocation4], 128  }
   0xc   :  { %1794 = vsyncadd [#allocation4], 4294967168  ;;  %v1796_v0 = vmov 0.0   ;;  %vm1797_vm0 = vmmov 0   ;;  %v1865_v1 = vld [vmem:[%s2192_s2 + $0x18] sm:$0xff]  ;;  %v46_v2 = vld [vmem:[#allocation3] sm:$0xff] }
   0xd   :  { %1540 = vmatprep.subr.mxu1 %v1796_v0  ;;  %1548 = vmatprep.mubr.msk.f32.mxu1 %vm1797_vm0, %v1796_v0  ;;  %v44_v3 = vld [vmem:[%s2190_s0] sm:$0xff]  ;;  %vm54_vm1 = vcmask 64512   ;;  %v1874_v4 = vld [vmem:[%s2192_s2 + $0x10] sm:$0xff]  ;;  %v45_v5 = vld [vmem:[%s2190_s0 + $0x8] sm:$0xff]  ;;  %vm142_vm2 = vcmask 261120   ;;  %s1799_s12 = smov 64  }
   0xe   :  { %1541 = vmatpush3.msra.mxu1 %v1865_v1  ;;  %1535 = vmatprep.subr.mxu0 %v46_v2  ;;  %v1883_v6 = vld [vmem:[%s2192_s2 + $0x8] sm:$0xff]  ;;  %v141_v7 = vld [vmem:[%s2195_s5] sm:$0x3]  ;;  %s1798_s5 = smov 32   ;;  %vm290_vm3 = vcmask 1041409   ;;  %vm286_vm4 = vcmask 253952  }
   0xf   :  { %1542 = vmatprep.subr.mxu1 %v1796_v0  ;;  %1536 = vmatpush3.msra.mxu0 %v46_v2  ;;  %v237_v8 = vrot.slane %v141_v7, 1  ;;  %v1895_v9 = vld [vmem:[%s2192_s2] sm:$0xff]  ;;  %vm434_vm5 = vcmask 254977   ;;  %vm582_vm6 = vcmask 256002   ;;  %vm731_vm7 = vcmask 257027  }
  0x10   :  { %1537 = vmatprep.mubr.msk.f32.mxu0 %vm54_vm1, %v44_v3  ;;  %1543 = vmatpush3.msra.mxu1 %v1874_v4  ;;  %v140_v10 = vld [vmem:[%s2194_s4] sm:$0x3]  ;;  %vm880_vm8 = vcmask 258052   ;;  %vm1029_vm9 = vcmask 259077   ;;  %vm1178_vm10 = vcmask 260102   ;;  %vm1327_vm11 = vcmask 261127  }
  0x11   :  { %1538 = vmatmul.mubr.msk.f32.vlgmr.msra.gmra.mxu0 %vm54_vm1, %v45_v5  ;;  %1544 = vmatprep.subr.mxu1 %v1796_v0  ;;  %v1456_v12 = vld [vmem:[%s2193_s3] ss:$0 sm:$0xff] }
  0x12   :  { %1545 = vmatpush3.msra.mxu1 %v1883_v6  ;;  %240 = vrot.lane.b32.xlu1 %v237_v8, %s1798_s5 }
  0x13   :  { %1546 = vmatprep.subr.mxu1 %v1796_v0  ;;  %1551 = vmatprep.subr.mxu0 %v1796_v0 }
  0x14   :  { %1547 = vmatpush3.msra.mxu1 %v1895_v9  ;;  %1552 = vmatpush3.msra.mxu0 %v1865_v1 }
  0x15   :  { %1549 = vmatmul.mubr.msk.f32.vlgmr.msra.gmra.mxu1 %vm142_vm2, %v140_v10  ;;  %1553 = vmatprep.subr.mxu0 %v1796_v0 }
  0x16   :  { %238 = vrot.lane.b32.xlu1 %v141_v7, %s1798_s5  ;;  %1554 = vmatpush3.msra.mxu0 %v1874_v4 }
  0x17   :  { %1555 = vmatprep.subr.mxu0 %v1796_v0  ;;  %1559 = vmatprep.mubr.msk.f32.mxu0 %vm1797_vm0, %v1796_v0 }
  0x18   :  { %1556 = vmatpush3.msra.mxu0 %v1883_v6  ;;  %1562 = vmatprep.subr.mxu1 %v1796_v0 }
  0x19   :  { %1557 = vmatprep.subr.mxu0 %v1796_v0  ;;  %1563 = vmatpush3.msra.mxu1 %v1865_v1 }
  0x1a   :  { %1558 = vmatpush3.msra.mxu0 %v1895_v9  ;;  %1564 = vmatprep.subr.mxu1 %v1796_v0 }
  0x1b   :  { %1565 = vmatpush3.msra.mxu1 %v1874_v4  ;;  %1570 = vmatprep.mubr.msk.f32.mxu1 %vm1797_vm0, %v1796_v0 }
  0x1c   :  { %1566 = vmatprep.subr.mxu1 %v1796_v0  ;;  %1573 = vmatprep.subr.mxu0 %v1796_v0 }
  0x1d   :  { %1567 = vmatpush3.msra.mxu1 %v1883_v6 }
  0x1e   :  { %1568 = vmatprep.subr.mxu1 %v1796_v0 }
  0x1f   :  { %1569 = vmatpush3.msra.mxu1 %v1895_v9 }
  0x20   :  { %1584 = vmatprep.subr.mxu1 %v1796_v0 }
  0x84   :  { %v241_v35 = vpop.permute.xlu1 %240 }
  0x88   :  { %v239_v37 = vpop.permute.xlu1 %238 }
  0xd1   :  { %v1539_v11 = vpop.f32.mrf.mxu0 }
  0xd2   :  { %v1931_v13 = vadd.f32 %v1539_v11, %v1456_v12 }
  0xd3   :  { %v127_v14 = vpop.f32.mrf.mxu0 }
  0xd4   :  { %v1933_v17 = vadd.f32 %v1456_v12, %v127_v14 }
  0xd5   :  { %v212_v15 = vpop.f32.mrf.mxu1 }
  0xd6   :  { %v217_v16 = vrot.slane %v212_v15, 1  ;;  %v220_v20 = vadd.f32 %v212_v15, %v1933_v17 }
  0xd7   :  { %v1550_v18 = vpop.f32.mrf.mxu1 }
  0xd8   :  { %v221_v19 = vadd.f32 %v217_v16, %v1931_v13  ;;  %v1460_v24 = vmul.f32 -1.442695, %v220_v20 }
  0xda   :  { %1645 = vtanh.f32 %v221_v19  ;;  %v1461_v23 = vmul.f32 -1.442695, %v221_v19 }
  0xdb   :  { %1647 = vtanh.f32 %v220_v20 }
  0xdc   :  { %1649 = vpow2.f32 %v1461_v23 }
  0xdd   :  { %1651 = vpow2.f32 %v1460_v24 }
  0xe7   :  { %v1646_v21 = vpop.eup %1645 }
  0xe8   :  { %250 = vrot.lane.b32.xlu0 %v1646_v21, %s1799_s12  ;;  %v1648_v22 = vpop.eup %1647 }
  0xe9   :  { %v1650_v25 = vpop.eup %1649 }
  0xea   :  { %v229_v26 = vadd.f32 1.0, %v1650_v25  ;;  %v1652_v27 = vpop.eup %1651 }
  0xeb   :  { %v228_v28 = vadd.f32 1.0, %v1652_v27 }
  0xec   :  { %248 = vrot.lane.b32.xlu0 %v1648_v22, %s1799_s12  ;;  %1653 = vrcp.f32 %v229_v26 }
  0xed   :  { %1655 = vrcp.f32 %v228_v28 }
  0xf9   :  { %v1654_v29 = vpop.eup %1653 }
  0xfa   :  { %v1656_v32 = vpop.eup %1655  ;;  %v245_v36 = vmul.f32 %v1654_v29, %v241_v35 }
  0xfb   :  { %v244_v40 = vmul.f32 %v1656_v32, %v239_v37 }
 0x15a   :  { %v251_v30 = vpop.permute.xlu0 %250 }
 0x15b   :  { %v255_v31 = vmul.f32 %v1654_v29, %v251_v30 }
 0x15d   :  { %260 = vrot.lane.b32.xlu0 %v255_v31, %s1798_s5 }
 0x15e   :  { %v249_v33 = vpop.permute.xlu0 %248 }
 0x15f   :  { %v254_v34 = vmul.f32 %v1656_v32, %v249_v33 }
 0x161   :  { %258 = vrot.lane.b32.xlu1 %v254_v34, %s1798_s5 }
 0x1cf   :  { %v261_v38 = vpop.permute.xlu0 %260 }
 0x1d0   :  { %v265_v39 = vadd.f32 %v261_v38, %v245_v36 }
 0x1d2   :  { %1657 = vtanh.f32 %v265_v39  ;;  %v389_v12 = vrot.slane %v265_v39, 7 }
 0x1d3   :  { %v259_v41 = vpop.permute.xlu1 %258 }
 0x1d4   :  { %v264_v42 = vadd.f32 %v259_v41, %v244_v40 }
 0x1d6   :  { %1659 = vtanh.f32 %v264_v42  ;;  %v388_v15 = vrot.slane %v264_v42, 7 }
 0x1df   :  { %v1658_v43 = vpop.eup %1657 }
 0x1e0   :  { %272 = vrot.lane.b32.xlu0 %v1658_v43, %s1799_s12 }
 0x1e3   :  { %v1660_v44 = vpop.eup %1659 }
 0x1e4   :  { %270 = vrot.lane.b32.xlu1 %v1660_v44, %s1799_s12 }
 0x252   :  { %v273_v45 = vpop.permute.xlu0 %272 }
 0x253   :  { %v1943_v46 = vmul.f32 %v1654_v29, %v273_v45 }
 0x255   :  { %v289_v48 = vrot.slane %v1943_v46, 7 }
 0x256   :  { %v271_v47 = vpop.permute.xlu1 %270 }
 0x257   :  { %v1946_v49 = vmul.f32 %v1656_v32, %v271_v47 }
 0x259   :  { %v291_v50 = vsel %vm290_vm3, %v289_v48, %v1946_v49 }
 0x25a   :  { %292 = vrot.lane.b32.xlu0 %v291_v50, %s1798_s5 }
 0x2cc   :  { %v293_v51 = vpop.permute.xlu0 %292 }
 0x2cd   :  { %1560 = vmatmul.mubr.msk.f32.vlgmr.msra.gmra.mxu0 %vm142_vm2, %v293_v51 }
 0x2ce   :  { %1574 = vmatpush3.msra.mxu0 %v1865_v1  ;;  %1581 = vmatprep.mubr.msk.f32.mxu0 %vm1797_vm0, %v1796_v0 }
 0x2cf   :  { %1575 = vmatprep.subr.mxu0 %v1796_v0 }
 0x2d0   :  { %1576 = vmatpush3.msra.mxu0 %v1874_v4 }
 0x2d1   :  { %1577 = vmatprep.subr.mxu0 %v1796_v0 }
 0x2d2   :  { %1578 = vmatpush3.msra.mxu0 %v1883_v6 }
 0x2d3   :  { %1579 = vmatprep.subr.mxu0 %v1796_v0 }
 0x2d4   :  { %1580 = vmatpush3.msra.mxu0 %v1895_v9 }
 0x2d5   :  { %1595 = vmatprep.subr.mxu0 %v1796_v0 }
 0x38d   :  { %v362_v52 = vpop.f32.mrf.mxu0 }
 0x38e   :  { %v367_v53 = vrot.slane %v362_v52, 7  ;;  %v371_v54 = vadd.f32 %v362_v52, %v1931_v13 }
 0x38f   :  { %v1561_v55 = vpop.f32.mrf.mxu0 }
 0x390   :  { %v370_v56 = vadd.f32 %v367_v53, %v1933_v17  ;;  %1661 = vtanh.f32 %v371_v54  ;;  %v1464_v59 = vmul.f32 -1.442695, %v371_v54 }
 0x392   :  { %1663 = vtanh.f32 %v370_v56  ;;  %v1463_v60 = vmul.f32 -1.442695, %v370_v56 }
 0x393   :  { %1665 = vpow2.f32 %v1464_v59 }
 0x394   :  { %1667 = vpow2.f32 %v1463_v60 }
 0x39d   :  { %v1662_v57 = vpop.eup %1661 }
 0x39e   :  { %398 = vrot.lane.b32.xlu0 %v1662_v57, %s1799_s12 }
 0x39f   :  { %v1664_v58 = vpop.eup %1663 }
 0x3a0   :  { %396 = vrot.lane.b32.xlu1 %v1664_v58, %s1799_s12  ;;  %v1666_v61 = vpop.eup %1665 }
 0x3a1   :  { %v1668_v62 = vpop.eup %1667  ;;  %v379_v63 = vadd.f32 1.0, %v1666_v61 }
 0x3a2   :  { %v378_v2 = vadd.f32 1.0, %v1668_v62 }
 0x3a3   :  { %1669 = vrcp.f32 %v379_v63 }
 0x3a4   :  { %1671 = vrcp.f32 %v378_v2 }
 0x3b0   :  { %v1670_v3 = vpop.eup %1669 }
 0x3b1   :  { %v1672_v8 = vpop.eup %1671  ;;  %v393_v14 = vmul.f32 %v1670_v3, %v389_v12 }
 0x3b2   :  { %v392_v19 = vmul.f32 %v1672_v8, %v388_v15 }
 0x410   :  { %v399_v5 = vpop.permute.xlu0 %398 }
 0x411   :  { %v403_v7 = vmul.f32 %v1670_v3, %v399_v5 }
 0x412   :  { %v397_v10 = vpop.permute.xlu1 %396 }
 0x413   :  { %408 = vrot.lane.b32.xlu0 %v403_v7, %s1798_s5  ;;  %v402_v11 = vmul.f32 %v1672_v8, %v397_v10 }
 0x415   :  { %406 = vrot.lane.b32.xlu1 %v402_v11, %s1798_s5 }
 0x485   :  { %v409_v16 = vpop.permute.xlu0 %408 }
 0x486   :  { %v413_v18 = vadd.f32 %v409_v16, %v393_v14 }
 0x487   :  { %v407_v20 = vpop.permute.xlu1 %406 }
 0x488   :  { %1673 = vtanh.f32 %v413_v18  ;;  %v412_v21 = vadd.f32 %v407_v20, %v392_v19  ;;  %v537_v54 = vrot.slane %v413_v18, 7 }
 0x48a   :  { %1675 = vtanh.f32 %v412_v21  ;;  %v536_v53 = vrot.slane %v412_v21, 7 }
 0x495   :  { %v1674_v22 = vpop.eup %1673 }
 0x496   :  { %420 = vrot.lane.b32.xlu0 %v1674_v22, %s1799_s12 }
 0x497   :  { %v1676_v23 = vpop.eup %1675 }
 0x498   :  { %418 = vrot.lane.b32.xlu1 %v1676_v23, %s1799_s12 }
 0x508   :  { %v421_v24 = vpop.permute.xlu0 %420 }
 0x509   :  { %v1972_v27 = vmul.f32 %v1670_v3, %v421_v24 }
 0x50a   :  { %v419_v25 = vpop.permute.xlu1 %418 }
 0x50b   :  { %v1970_v26 = vmul.f32 %v1672_v8, %v419_v25 }
 0x50d   :  { %v437_v28 = vrot.slane %v1970_v26, 1 }
 0x50f   :  { %v438_v29 = vsel %vm290_vm3, %v1972_v27, %v437_v28 }
 0x510   :  { %439 = vrot.lane.b32.xlu1 %v438_v29, %s1798_s5 }
 0x582   :  { %v440_v30 = vpop.permute.xlu1 %439 }
 0x583   :  { %1571 = vmatmul.mubr.msk.f32.vlgmr.msra.gmra.mxu1 %vm142_vm2, %v440_v30 }
 0x584   :  { %1585 = vmatpush3.msra.mxu1 %v1865_v1  ;;  %1592 = vmatprep.mubr.msk.f32.mxu1 %vm1797_vm0, %v1796_v0 }
 0x585   :  { %1586 = vmatprep.subr.mxu1 %v1796_v0 }
 0x586   :  { %1587 = vmatpush3.msra.mxu1 %v1874_v4 }
 0x587   :  { %1588 = vmatprep.subr.mxu1 %v1796_v0 }
 0x588   :  { %1589 = vmatpush3.msra.mxu1 %v1883_v6 }
 0x589   :  { %1590 = vmatprep.subr.mxu1 %v1796_v0 }
 0x58a   :  { %1591 = vmatpush3.msra.mxu1 %v1895_v9 }
 0x58b   :  { %1606 = vmatprep.subr.mxu1 %v1796_v0 }
 0x643   :  { %v509_v31 = vpop.f32.mrf.mxu1 }
 0x644   :  { %v514_v32 = vrot.slane %v509_v31, 6  ;;  %v515_v33 = vrot.slane %v509_v31, 7 }
 0x645   :  { %v1572_v34 = vpop.f32.mrf.mxu1 }
 0x646   :  { %v518_v35 = vadd.f32 %v514_v32, %v1933_v17  ;;  %v519_v36 = vadd.f32 %v515_v33, %v1931_v13 }
 0x648   :  { %1677 = vtanh.f32 %v518_v35  ;;  %v1466_v39 = vmul.f32 -1.442695, %v518_v35  ;;  %v1467_v40 = vmul.f32 -1.442695, %v519_v36 }
 0x649   :  { %1679 = vtanh.f32 %v519_v36 }
 0x64a   :  { %1681 = vpow2.f32 %v1466_v39 }
 0x64b   :  { %1683 = vpow2.f32 %v1467_v40 }
 0x655   :  { %v1678_v37 = vpop.eup %1677 }
 0x656   :  { %v1680_v38 = vpop.eup %1679  ;;  %544 = vrot.lane.b32.xlu0 %v1678_v37, %s1799_s12 }
 0x657   :  { %546 = vrot.lane.b32.xlu1 %v1680_v38, %s1799_s12  ;;  %v1682_v41 = vpop.eup %1681 }
 0x658   :  { %v1684_v42 = vpop.eup %1683  ;;  %v526_v43 = vadd.f32 1.0, %v1682_v41 }
 0x659   :  { %v527_v44 = vadd.f32 1.0, %v1684_v42 }
 0x65a   :  { %1685 = vrcp.f32 %v526_v43 }
 0x65b   :  { %1687 = vrcp.f32 %v527_v44 }
 0x667   :  { %v1686_v45 = vpop.eup %1685 }
 0x668   :  { %v1688_v48 = vpop.eup %1687  ;;  %v540_v55 = vmul.f32 %v1686_v45, %v536_v53 }
 0x669   :  { %v541_v56 = vmul.f32 %v1688_v48, %v537_v54 }
 0x6c8   :  { %v545_v47 = vpop.permute.xlu0 %544 }
 0x6c9   :  { %v547_v50 = vpop.permute.xlu1 %546  ;;  %v550_v51 = vmul.f32 %v1686_v45, %v545_v47 }
 0x6ca   :  { %v551_v52 = vmul.f32 %v1688_v48, %v547_v50 }
 0x6cb   :  { %554 = vrot.lane.b32.xlu0 %v550_v51, %s1798_s5 }
 0x6cc   :  { %556 = vrot.lane.b32.xlu1 %v551_v52, %s1798_s5 }
 0x73d   :  { %v555_v57 = vpop.permute.xlu0 %554 }
 0x73e   :  { %v557_v58 = vpop.permute.xlu1 %556  ;;  %v560_v59 = vadd.f32 %v555_v57, %v540_v55 }
 0x73f   :  { %v561_v60 = vadd.f32 %v557_v58, %v541_v56 }
 0x740   :  { %1689 = vtanh.f32 %v560_v59  ;;  %v685_v36 = vrot.slane %v560_v59, 7 }
 0x741   :  { %1691 = vtanh.f32 %v561_v60  ;;  %v686_v37 = vrot.slane %v561_v60, 7 }
 0x74d   :  { %v1690_v61 = vpop.eup %1689 }
 0x74e   :  { %v1692_v62 = vpop.eup %1691  ;;  %566 = vrot.lane.b32.xlu0 %v1690_v61, %s1799_s12 }
 0x74f   :  { %568 = vrot.lane.b32.xlu1 %v1692_v62, %s1799_s12 }
 0x7c0   :  { %v567_v63 = vpop.permute.xlu0 %566 }
 0x7c1   :  { %v569_v2 = vpop.permute.xlu1 %568  ;;  %v1997_v3 = vmul.f32 %v1686_v45, %v567_v63 }
 0x7c2   :  { %v1999_v5 = vmul.f32 %v1688_v48, %v569_v2 }
 0x7c3   :  { %v585_v7 = vrot.slane %v1997_v3, 2 }
 0x7c4   :  { %v586_v8 = vrot.slane %v1999_v5, 1 }
 0x7c6   :  { %v587_v10 = vsel %vm290_vm3, %v586_v8, %v585_v7 }
 0x7c7   :  { %588 = vrot.lane.b32.xlu0 %v587_v10, %s1798_s5 }
 0x839   :  { %v589_v11 = vpop.permute.xlu0 %588 }
 0x83a   :  { %1582 = vmatmul.mubr.msk.f32.vlgmr.msra.gmra.mxu0 %vm142_vm2, %v589_v11 }
 0x83b   :  { %1596 = vmatpush3.msra.mxu0 %v1865_v1  ;;  %1603 = vmatprep.mubr.msk.f32.mxu0 %vm1797_vm0, %v1796_v0 }
 0x83c   :  { %1597 = vmatprep.subr.mxu0 %v1796_v0 }
 0x83d   :  { %1598 = vmatpush3.msra.mxu0 %v1874_v4 }
 0x83e   :  { %1599 = vmatprep.subr.mxu0 %v1796_v0 }
 0x83f   :  { %1600 = vmatpush3.msra.mxu0 %v1883_v6 }
 0x840   :  { %1601 = vmatprep.subr.mxu0 %v1796_v0 }
 0x841   :  { %1602 = vmatpush3.msra.mxu0 %v1895_v9 }
 0x842   :  { %1617 = vmatprep.subr.mxu0 %v1796_v0 }
 0x8fa   :  { %v658_v12 = vpop.f32.mrf.mxu0 }
 0x8fb   :  { %v663_v14 = vrot.slane %v658_v12, 5  ;;  %v664_v15 = vrot.slane %v658_v12, 6 }
 0x8fc   :  { %v1583_v16 = vpop.f32.mrf.mxu0 }
 0x8fd   :  { %v667_v18 = vadd.f32 %v663_v14, %v1933_v17  ;;  %v668_v19 = vadd.f32 %v664_v15, %v1931_v13 }
 0x8ff   :  { %1693 = vtanh.f32 %v667_v18  ;;  %v1469_v22 = vmul.f32 -1.442695, %v667_v18  ;;  %v1470_v23 = vmul.f32 -1.442695, %v668_v19 }
 0x900   :  { %1695 = vtanh.f32 %v668_v19 }
 0x901   :  { %1697 = vpow2.f32 %v1469_v22 }
 0x902   :  { %1699 = vpow2.f32 %v1470_v23 }
 0x90c   :  { %v1694_v20 = vpop.eup %1693 }
 0x90d   :  { %v1696_v21 = vpop.eup %1695  ;;  %693 = vrot.lane.b32.xlu1 %v1694_v20, %s1799_s12 }
 0x90e   :  { %695 = vrot.lane.b32.xlu0 %v1696_v21, %s1799_s12  ;;  %v1698_v24 = vpop.eup %1697 }
 0x90f   :  { %v1700_v25 = vpop.eup %1699  ;;  %v675_v28 = vadd.f32 1.0, %v1698_v24 }
 0x910   :  { %v676_v29 = vadd.f32 1.0, %v1700_v25 }
 0x911   :  { %1701 = vrcp.f32 %v675_v28 }
 0x912   :  { %1703 = vrcp.f32 %v676_v29 }
 0x91e   :  { %v1702_v30 = vpop.eup %1701 }
 0x91f   :  { %v1704_v32 = vpop.eup %1703  ;;  %v689_v38 = vmul.f32 %v1702_v30, %v685_v36 }
 0x920   :  { %v690_v39 = vmul.f32 %v1704_v32, %v686_v37 }
 0x97f   :  { %v694_v31 = vpop.permute.xlu1 %693 }
 0x980   :  { %v696_v33 = vpop.permute.xlu0 %695  ;;  %v699_v34 = vmul.f32 %v1702_v30, %v694_v31 }
 0x981   :  { %v700_v35 = vmul.f32 %v1704_v32, %v696_v33 }
 0x982   :  { %703 = vrot.lane.b32.xlu1 %v699_v34, %s1798_s5 }
 0x983   :  { %705 = vrot.lane.b32.xlu0 %v700_v35, %s1798_s5 }
 0x9f4   :  { %v704_v40 = vpop.permute.xlu1 %703 }
 0x9f5   :  { %v706_v41 = vpop.permute.xlu0 %705  ;;  %v709_v42 = vadd.f32 %v704_v40, %v689_v38 }
 0x9f6   :  { %v710_v43 = vadd.f32 %v706_v41, %v690_v39 }
 0x9f7   :  { %1705 = vtanh.f32 %v709_v42  ;;  %v834_v21 = vrot.slane %v709_v42, 7 }
 0x9f8   :  { %1707 = vtanh.f32 %v710_v43  ;;  %v835_v22 = vrot.slane %v710_v43, 7 }
 0xa04   :  { %v1706_v44 = vpop.eup %1705 }
 0xa05   :  { %v1708_v45 = vpop.eup %1707  ;;  %715 = vrot.lane.b32.xlu1 %v1706_v44, %s1799_s12 }
 0xa06   :  { %717 = vrot.lane.b32.xlu0 %v1708_v45, %s1799_s12 }
 0xa77   :  { %v716_v47 = vpop.permute.xlu1 %715 }
 0xa78   :  { %v718_v48 = vpop.permute.xlu0 %717  ;;  %v2024_v50 = vmul.f32 %v1702_v30, %v716_v47 }
 0xa79   :  { %v2026_v51 = vmul.f32 %v1704_v32, %v718_v48 }
 0xa7a   :  { %v734_v52 = vrot.slane %v2024_v50, 3 }
 0xa7b   :  { %v735_v53 = vrot.slane %v2026_v51, 2 }
 0xa7d   :  { %v736_v54 = vsel %vm290_vm3, %v735_v53, %v734_v52 }
 0xa7e   :  { %737 = vrot.lane.b32.xlu1 %v736_v54, %s1798_s5 }
 0xaf0   :  { %v738_v55 = vpop.permute.xlu1 %737 }
 0xaf1   :  { %1593 = vmatmul.mubr.msk.f32.vlgmr.msra.gmra.mxu1 %vm142_vm2, %v738_v55 }
 0xaf2   :  { %1607 = vmatpush3.msra.mxu1 %v1865_v1  ;;  %1614 = vmatprep.mubr.msk.f32.mxu1 %vm1797_vm0, %v1796_v0 }
 0xaf3   :  { %1608 = vmatprep.subr.mxu1 %v1796_v0 }
 0xaf4   :  { %1609 = vmatpush3.msra.mxu1 %v1874_v4 }
 0xaf5   :  { %1610 = vmatprep.subr.mxu1 %v1796_v0 }
 0xaf6   :  { %1611 = vmatpush3.msra.mxu1 %v1883_v6 }
 0xaf7   :  { %1612 = vmatprep.subr.mxu1 %v1796_v0 }
 0xaf8   :  { %1613 = vmatpush3.msra.mxu1 %v1895_v9 }
 0xbb1   :  { %v807_v56 = vpop.f32.mrf.mxu1 }
 0xbb2   :  { %v812_v57 = vrot.slane %v807_v56, 4  ;;  %v813_v58 = vrot.slane %v807_v56, 5 }
 0xbb3   :  { %v1594_v59 = vpop.f32.mrf.mxu1 }
 0xbb4   :  { %v816_v60 = vadd.f32 %v812_v57, %v1933_v17  ;;  %v817_v61 = vadd.f32 %v813_v58, %v1931_v13 }
 0xbb6   :  { %1709 = vtanh.f32 %v816_v60  ;;  %v1472_v2 = vmul.f32 -1.442695, %v816_v60  ;;  %v1473_v7 = vmul.f32 -1.442695, %v817_v61 }
 0xbb7   :  { %1711 = vtanh.f32 %v817_v61 }
 0xbb8   :  { %1713 = vpow2.f32 %v1472_v2 }
 0xbb9   :  { %1715 = vpow2.f32 %v1473_v7 }
 0xbc3   :  { %v1710_v62 = vpop.eup %1709 }
 0xbc4   :  { %v1712_v63 = vpop.eup %1711  ;;  %842 = vrot.lane.b32.xlu0 %v1710_v62, %s1799_s12 }
 0xbc5   :  { %844 = vrot.lane.b32.xlu1 %v1712_v63, %s1799_s12  ;;  %v1714_v8 = vpop.eup %1713 }
 0xbc6   :  { %v1716_v10 = vpop.eup %1715  ;;  %v824_v11 = vadd.f32 1.0, %v1714_v8 }
 0xbc7   :  { %v825_v12 = vadd.f32 1.0, %v1716_v10 }
 0xbc8   :  { %1717 = vrcp.f32 %v824_v11 }
 0xbc9   :  { %1719 = vrcp.f32 %v825_v12 }
 0xbd5   :  { %v1718_v14 = vpop.eup %1717 }
 0xbd6   :  { %v1720_v16 = vpop.eup %1719  ;;  %v838_v23 = vmul.f32 %v1718_v14, %v834_v21 }
 0xbd7   :  { %v839_v24 = vmul.f32 %v1720_v16, %v835_v22 }
 0xc36   :  { %v843_v15 = vpop.permute.xlu0 %842 }
 0xc37   :  { %v845_v18 = vpop.permute.xlu1 %844  ;;  %v848_v19 = vmul.f32 %v1718_v14, %v843_v15 }
 0xc38   :  { %v849_v20 = vmul.f32 %v1720_v16, %v845_v18 }
 0xc39   :  { %852 = vrot.lane.b32.xlu0 %v848_v19, %s1798_s5 }
 0xc3a   :  { %854 = vrot.lane.b32.xlu1 %v849_v20, %s1798_s5 }
 0xcab   :  { %v853_v25 = vpop.permute.xlu0 %852 }
 0xcac   :  { %v855_v28 = vpop.permute.xlu1 %854  ;;  %v858_v29 = vadd.f32 %v853_v25, %v838_v23 }
 0xcad   :  { %v859_v30 = vadd.f32 %v855_v28, %v839_v24 }
 0xcae   :  { %1721 = vtanh.f32 %v858_v29  ;;  %v983_v60 = vrot.slane %v858_v29, 7 }
 0xcaf   :  { %1723 = vtanh.f32 %v859_v30  ;;  %v984_v61 = vrot.slane %v859_v30, 7 }
 0xcbb   :  { %v1722_v31 = vpop.eup %1721 }
 0xcbc   :  { %v1724_v32 = vpop.eup %1723  ;;  %864 = vrot.lane.b32.xlu0 %v1722_v31, %s1799_s12 }
 0xcbd   :  { %866 = vrot.lane.b32.xlu1 %v1724_v32, %s1799_s12 }
 0xd2e   :  { %v865_v33 = vpop.permute.xlu0 %864 }
 0xd2f   :  { %v867_v34 = vpop.permute.xlu1 %866  ;;  %v2050_v35 = vmul.f32 %v1718_v14, %v865_v33 }
 0xd30   :  { %v2052_v36 = vmul.f32 %v1720_v16, %v867_v34 }
 0xd31   :  { %v883_v37 = vrot.slane %v2050_v35, 4 }
 0xd32   :  { %v884_v38 = vrot.slane %v2052_v36, 3 }
 0xd34   :  { %v885_v39 = vsel %vm290_vm3, %v884_v38, %v883_v37 }
 0xd35   :  { %886 = vrot.lane.b32.xlu0 %v885_v39, %s1798_s5 }
 0xda7   :  { %v887_v40 = vpop.permute.xlu0 %886 }
 0xda8   :  { %1604 = vmatmul.mubr.msk.f32.vlgmr.msra.gmra.mxu0 %vm142_vm2, %v887_v40 }
 0xda9   :  { %1618 = vmatpush3.msra.mxu0 %v1865_v1  ;;  %1625 = vmatprep.mubr.msk.f32.mxu0 %vm1797_vm0, %v1796_v0 }
 0xdaa   :  { %1619 = vmatprep.subr.mxu0 %v1796_v0 }
 0xdab   :  { %1620 = vmatpush3.msra.mxu0 %v1874_v4 }
 0xdac   :  { %1621 = vmatprep.subr.mxu0 %v1796_v0 }
 0xdad   :  { %1622 = vmatpush3.msra.mxu0 %v1883_v6 }
 0xdae   :  { %1623 = vmatprep.subr.mxu0 %v1796_v0 }
 0xdaf   :  { %1624 = vmatpush3.msra.mxu0 %v1895_v9 }
 0xe68   :  { %v956_v41 = vpop.f32.mrf.mxu0 }
 0xe69   :  { %v961_v42 = vrot.slane %v956_v41, 3  ;;  %v962_v43 = vrot.slane %v956_v41, 4 }
 0xe6a   :  { %v1605_v44 = vpop.f32.mrf.mxu0 }
 0xe6b   :  { %v965_v1 = vadd.f32 %v961_v42, %v1933_v17  ;;  %v966_v45 = vadd.f32 %v962_v43, %v1931_v13 }
 0xe6d   :  { %1725 = vtanh.f32 %v965_v1  ;;  %v1475_v6 = vmul.f32 -1.442695, %v965_v1  ;;  %v1476_v0 = vmul.f32 -1.442695, %v966_v45 }
 0xe6e   :  { %1727 = vtanh.f32 %v966_v45 }
 0xe6f   :  { %1729 = vpow2.f32 %v1475_v6 }
 0xe70   :  { %1731 = vpow2.f32 %v1476_v0 }
 0xe7a   :  { %v1726_v47 = vpop.eup %1725 }
 0xe7b   :  { %v1728_v4 = vpop.eup %1727  ;;  %991 = vrot.lane.b32.xlu1 %v1726_v47, %s1799_s12 }
 0xe7c   :  { %993 = vrot.lane.b32.xlu0 %v1728_v4, %s1799_s12  ;;  %v1730_v9 = vpop.eup %1729 }
 0xe7d   :  { %v1732_v48 = vpop.eup %1731  ;;  %v973_v52 = vadd.f32 1.0, %v1730_v9 }
 0xe7e   :  { %v974_v53 = vadd.f32 1.0, %v1732_v48 }
 0xe7f   :  { %1733 = vrcp.f32 %v973_v52 }
 0xe80   :  { %1735 = vrcp.f32 %v974_v53 }
 0xe8c   :  { %v1734_v54 = vpop.eup %1733 }
 0xe8d   :  { %v1736_v56 = vpop.eup %1735  ;;  %v987_v62 = vmul.f32 %v1734_v54, %v983_v60 }
 0xe8e   :  { %v988_v63 = vmul.f32 %v1736_v56, %v984_v61 }
 0xeed   :  { %v992_v55 = vpop.permute.xlu1 %991 }
 0xeee   :  { %v994_v57 = vpop.permute.xlu0 %993  ;;  %v997_v58 = vmul.f32 %v1734_v54, %v992_v55 }
 0xeef   :  { %v998_v59 = vmul.f32 %v1736_v56, %v994_v57 }
 0xef0   :  { %1001 = vrot.lane.b32.xlu1 %v997_v58, %s1798_s5 }
 0xef1   :  { %1003 = vrot.lane.b32.xlu0 %v998_v59, %s1798_s5 }
 0xf62   :  { %v1002_v2 = vpop.permute.xlu1 %1001 }
 0xf63   :  { %v1004_v7 = vpop.permute.xlu0 %1003  ;;  %v1007_v8 = vadd.f32 %v1002_v2, %v987_v62 }
 0xf64   :  { %v1008_v10 = vadd.f32 %v1004_v7, %v988_v63 }
 0xf65   :  { %1737 = vtanh.f32 %v1007_v8  ;;  %v1132_v47 = vrot.slane %v1007_v8, 7 }
 0xf66   :  { %1739 = vtanh.f32 %v1008_v10  ;;  %v1133_v4 = vrot.slane %v1008_v10, 7 }
 0xf72   :  { %v1738_v11 = vpop.eup %1737 }
 0xf73   :  { %v1740_v12 = vpop.eup %1739  ;;  %1013 = vrot.lane.b32.xlu1 %v1738_v11, %s1799_s12 }
 0xf74   :  { %1015 = vrot.lane.b32.xlu0 %v1740_v12, %s1799_s12 }
 0xfe5   :  { %v1014_v14 = vpop.permute.xlu1 %1013 }
 0xfe6   :  { %v1016_v15 = vpop.permute.xlu0 %1015  ;;  %v2076_v16 = vmul.f32 %v1734_v54, %v1014_v14 }
 0xfe7   :  { %v2078_v18 = vmul.f32 %v1736_v56, %v1016_v15 }
 0xfe8   :  { %v1032_v19 = vrot.slane %v2076_v16, 5 }
 0xfe9   :  { %v1033_v20 = vrot.slane %v2078_v18, 4 }
 0xfeb   :  { %v1034_v21 = vsel %vm290_vm3, %v1033_v20, %v1032_v19 }
 0xfec   :  { %1035 = vrot.lane.b32.xlu1 %v1034_v21, %s1798_s5 }
0x105e   :  { %v1036_v22 = vpop.permute.xlu1 %1035 }
0x105f   :  { %1615 = vmatmul.mubr.msk.f32.vlgmr.msra.gmra.mxu1 %vm142_vm2, %v1036_v22 }
0x111f   :  { %v1105_v23 = vpop.f32.mrf.mxu1 }
0x1120   :  { %v1110_v24 = vrot.slane %v1105_v23, 2  ;;  %v1111_v25 = vrot.slane %v1105_v23, 3 }
0x1121   :  { %v1616_v28 = vpop.f32.mrf.mxu1 }
0x1122   :  { %v1114_v29 = vadd.f32 %v1110_v24, %v1933_v17  ;;  %v1115_v30 = vadd.f32 %v1111_v25, %v1931_v13 }
0x1124   :  { %1741 = vtanh.f32 %v1114_v29  ;;  %v1478_v33 = vmul.f32 -1.442695, %v1114_v29  ;;  %v1479_v34 = vmul.f32 -1.442695, %v1115_v30 }
0x1125   :  { %1743 = vtanh.f32 %v1115_v30 }
0x1126   :  { %1745 = vpow2.f32 %v1478_v33 }
0x1127   :  { %1747 = vpow2.f32 %v1479_v34 }
0x1131   :  { %v1742_v31 = vpop.eup %1741 }
0x1132   :  { %v1744_v32 = vpop.eup %1743  ;;  %1140 = vrot.lane.b32.xlu0 %v1742_v31, %s1799_s12 }
0x1133   :  { %1142 = vrot.lane.b32.xlu1 %v1744_v32, %s1799_s12  ;;  %v1746_v37 = vpop.eup %1745 }
0x1134   :  { %v1748_v38 = vpop.eup %1747  ;;  %v1122_v39 = vadd.f32 1.0, %v1746_v37 }
0x1135   :  { %v1123_v40 = vadd.f32 1.0, %v1748_v38 }
0x1136   :  { %1749 = vrcp.f32 %v1122_v39 }
0x1137   :  { %1751 = vrcp.f32 %v1123_v40 }
0x1143   :  { %v1750_v41 = vpop.eup %1749 }
0x1144   :  { %v1752_v43 = vpop.eup %1751  ;;  %v1136_v6 = vmul.f32 %v1750_v41, %v1132_v47 }
0x1145   :  { %v1137_v0 = vmul.f32 %v1752_v43, %v1133_v4 }
0x11a4   :  { %v1141_v42 = vpop.permute.xlu0 %1140 }
0x11a5   :  { %v1143_v44 = vpop.permute.xlu1 %1142  ;;  %v1146_v1 = vmul.f32 %v1750_v41, %v1141_v42 }
0x11a6   :  { %v1147_v45 = vmul.f32 %v1752_v43, %v1143_v44 }
0x11a7   :  { %1150 = vrot.lane.b32.xlu0 %v1146_v1, %s1798_s5 }
0x11a8   :  { %1152 = vrot.lane.b32.xlu1 %v1147_v45, %s1798_s5 }
0x1219   :  { %v1151_v9 = vpop.permute.xlu0 %1150 }
0x121a   :  { %v1153_v48 = vpop.permute.xlu1 %1152  ;;  %v1156_v52 = vadd.f32 %v1151_v9, %v1136_v6 }
0x121b   :  { %v1157_v53 = vadd.f32 %v1153_v48, %v1137_v0 }
0x121c   :  { %1753 = vtanh.f32 %v1156_v52  ;;  %v1281_v31 = vrot.slane %v1156_v52, 7 }
0x121d   :  { %1755 = vtanh.f32 %v1157_v53  ;;  %v1282_v32 = vrot.slane %v1157_v53, 7 }
0x1229   :  { %v1754_v54 = vpop.eup %1753 }
0x122a   :  { %v1756_v55 = vpop.eup %1755  ;;  %1162 = vrot.lane.b32.xlu0 %v1754_v54, %s1799_s12 }
0x122b   :  { %1164 = vrot.lane.b32.xlu1 %v1756_v55, %s1799_s12 }
0x129c   :  { %v1163_v56 = vpop.permute.xlu0 %1162 }
0x129d   :  { %v1165_v57 = vpop.permute.xlu1 %1164  ;;  %v1168_v58 = vmul.f32 %v1750_v41, %v1163_v56 }
0x129e   :  { %v2093_v59 = vmul.f32 %v1752_v43, %v1165_v57 }
0x129f   :  { %v1181_v60 = vrot.slane %v1168_v58, 6 }
0x12a0   :  { %v1182_v61 = vrot.slane %v2093_v59, 5 }
0x12a2   :  { %v1183_v62 = vsel %vm290_vm3, %v1182_v61, %v1181_v60  ;;  %v1483_v61 = vld [vmem:[%s2197_s7] ss:$0 sm:$0xff] }
0x12a3   :  { %1184 = vrot.lane.b32.xlu0 %v1183_v62, %s1798_s5 }
0x1315   :  { %v1185_v63 = vpop.permute.xlu0 %1184 }
0x1316   :  { %1626 = vmatmul.mubr.msk.f32.vlgmr.msra.gmra.mxu0 %vm142_vm2, %v1185_v63 }
0x13d6   :  { %v1254_v2 = vpop.f32.mrf.mxu0 }
0x13d7   :  { %v1259_v7 = vrot.slane %v1254_v2, 1  ;;  %v1260_v8 = vrot.slane %v1254_v2, 2 }
0x13d8   :  { %v1627_v10 = vpop.f32.mrf.mxu0 }
0x13d9   :  { %v1263_v11 = vadd.f32 %v1259_v7, %v1933_v17  ;;  %v1264_v12 = vadd.f32 %v1260_v8, %v1931_v13 }
0x13db   :  { %1757 = vtanh.f32 %v1263_v11  ;;  %v1481_v19 = vmul.f32 -1.442695, %v1263_v11  ;;  %v1482_v20 = vmul.f32 -1.442695, %v1264_v12 }
0x13dc   :  { %1759 = vtanh.f32 %v1264_v12 }
0x13dd   :  { %1761 = vpow2.f32 %v1481_v19 }
0x13de   :  { %1763 = vpow2.f32 %v1482_v20 }
0x13e8   :  { %v1758_v14 = vpop.eup %1757 }
0x13e9   :  { %v1760_v15 = vpop.eup %1759  ;;  %1289 = vrot.lane.b32.xlu1 %v1758_v14, %s1799_s12 }
0x13ea   :  { %1291 = vrot.lane.b32.xlu0 %v1760_v15, %s1799_s12  ;;  %v1762_v21 = vpop.eup %1761 }
0x13eb   :  { %v1764_v22 = vpop.eup %1763  ;;  %v1271_v23 = vadd.f32 1.0, %v1762_v21 }
0x13ec   :  { %v1272_v24 = vadd.f32 1.0, %v1764_v22 }
0x13ed   :  { %1765 = vrcp.f32 %v1271_v23 }
0x13ee   :  { %1767 = vrcp.f32 %v1272_v24 }
0x13fa   :  { %v1766_v17 = vpop.eup %1765 }
0x13fb   :  { %v1768_v25 = vpop.eup %1767  ;;  %v1285_v33 = vmul.f32 %v1766_v17, %v1281_v31 }
0x13fc   :  { %v1286_v34 = vmul.f32 %v1768_v25, %v1282_v32 }
0x145b   :  { %v1290_v13 = vpop.permute.xlu1 %1289 }
0x145c   :  { %v1292_v28 = vpop.permute.xlu0 %1291  ;;  %v1295_v29 = vmul.f32 %v1766_v17, %v1290_v13 }
0x145d   :  { %v1296_v30 = vmul.f32 %v1768_v25, %v1292_v28 }
0x145e   :  { %1299 = vrot.lane.b32.xlu1 %v1295_v29, %s1798_s5 }
0x145f   :  { %1301 = vrot.lane.b32.xlu0 %v1296_v30, %s1798_s5 }
0x14d0   :  { %v1300_v37 = vpop.permute.xlu1 %1299 }
0x14d1   :  { %v1302_v38 = vpop.permute.xlu0 %1301  ;;  %v1305_v39 = vadd.f32 %v1300_v37, %v1285_v33 }
0x14d2   :  { %v1306_v40 = vadd.f32 %v1302_v38, %v1286_v34 }
0x14d3   :  { %1769 = vtanh.f32 %v1305_v39 }
0x14d4   :  { %1771 = vtanh.f32 %v1306_v40 }
0x14e0   :  { %v1770_v41 = vpop.eup %1769 }
0x14e1   :  { %v1772_v42 = vpop.eup %1771  ;;  %1311 = vrot.lane.b32.xlu1 %v1770_v41, %s1799_s12 }
0x14e2   :  { %1313 = vrot.lane.b32.xlu0 %v1772_v42, %s1799_s12 }
0x14e5   :  { %280 = vrot.lane.b32.xlu1 %v1946_v49, %s1798_s5  ;;  %v1352_v49 = vld [vmem:[%s2196_s6 + $0x18] sm:$0xff] }
0x14e6   :  { %428 = vrot.lane.b32.xlu0 %v1970_v26, %s1798_s5  ;;  %1628 = vmatprep.subr.mxu1 %v1352_v49  ;;  %v1350_v26 = vld [vmem:[%s2196_s6 + $0x8] sm:$0xff] }
0x14e7   :  { %1629 = vmatpush3.msra.mxu1 %v1352_v49 }
0x14e9   :  { %576 = vrot.lane.b32.xlu1 %v1997_v3, %s1798_s5 }
0x14ea   :  { %725 = vrot.lane.b32.xlu0 %v2024_v50, %s1798_s5 }
0x14ed   :  { %874 = vrot.lane.b32.xlu1 %v2050_v35, %s1798_s5 }
0x14ee   :  { %1023 = vrot.lane.b32.xlu0 %v2076_v16, %s1798_s5 }
0x14f1   :  { %1172 = vrot.lane.b32.xlu1 %v1168_v58, %s1798_s5 }
0x14f2   :  { %430 = vrot.lane.b32.xlu0 %v1972_v27, %s1798_s5  ;;  %v1349_v27 = vld [vmem:[%s2196_s6] sm:$0xff] }
0x14f5   :  { %282 = vrot.lane.b32.xlu1 %v1943_v46, %s1798_s5  ;;  %v1351_v46 = vld [vmem:[%s2196_s6 + $0x10] sm:$0xff]  ;;  %s1800_s6 = smov 96  }
0x14f6   :  { %727 = vrot.lane.b32.xlu0 %v2026_v51, %s1798_s5  ;;  %1630 = vmatprep.subr.mxu1 %v1351_v46 }
0x14f7   :  { %1631 = vmatpush3.msra.mxu1 %v1351_v46 }
0x14f8   :  { %1632 = vmatprep.subr.mxu1 %v1350_v26 }
0x14f9   :  { %578 = vrot.lane.b32.xlu1 %v1999_v5, %s1798_s5  ;;  %1633 = vmatpush3.msra.mxu1 %v1350_v26 }
0x14fa   :  { %1025 = vrot.lane.b32.xlu0 %v2078_v18, %s1798_s5  ;;  %1634 = vmatprep.subr.mxu1 %v1349_v27  ;;  %v1338_v18 = vrot.slane %v1306_v40, 7 }
0x14fb   :  { %1635 = vmatpush3.msra.mxu1 %v1349_v27 }
0x14fd   :  { %876 = vrot.lane.b32.xlu1 %v2052_v36, %s1798_s5 }
0x1501   :  { %1174 = vrot.lane.b32.xlu1 %v2093_v59, %s1798_s5 }
0x1553   :  { %v1312_v3 = vpop.permute.xlu1 %1311 }
0x1554   :  { %v1314_v5 = vpop.permute.xlu0 %1313  ;;  %v1317_v50 = vmul.f32 %v1766_v17, %v1312_v3 }
0x1555   :  { %v1318_v51 = vmul.f32 %v1768_v25, %v1314_v5 }
0x1556   :  { %1321 = vrot.lane.b32.xlu0 %v1317_v50, %s1798_s5 }
0x1557   :  { %v1330_v35 = vrot.slane %v1318_v51, 7  ;;  %v281_v36 = vpop.permute.xlu1 %280 }
0x1558   :  { %v429_v16 = vpop.permute.xlu0 %428  ;;  %287 = vst.msk [vmem:[#allocation2] sm:$0x1] %vm286_vm4, %v281_v36 }
0x1559   :  { %435 = vst.msk [vmem:[#allocation2] sm:$0x2] %vm434_vm5, %v429_v16  ;;  %1331 = vrot.lane.b32.xlu1 %v1330_v35, %s1798_s5 }
0x155a   :  { %1323 = vrot.lane.b32.xlu0 %v1318_v51, %s1798_s5 }
0x155b   :  { %v577_v43 = vpop.permute.xlu1 %576 }
0x155c   :  { %v726_v44 = vpop.permute.xlu0 %725  ;;  %583 = vst.msk [vmem:[#allocation2] sm:$0x4] %vm582_vm6, %v577_v43 }
0x155d   :  { %732 = vst.msk [vmem:[#allocation2] sm:$0x8] %vm731_vm7, %v726_v44  ;;  %1341 = vrot.lane.b32.xlu1 %v1338_v18, %s1800_s6 }
0x155e   :  { %1339 = vrot.lane.b32.xlu0 %v1305_v39, %s1800_s6 }
0x155f   :  { %v875_v1 = vpop.permute.xlu1 %874 }
0x1560   :  { %v1024_v45 = vpop.permute.xlu0 %1023  ;;  %881 = vst.msk [vmem:[#allocation2] sm:$0x10] %vm880_vm8, %v875_v1 }
0x1561   :  { %1030 = vst.msk [vmem:[#allocation2] sm:$0x20] %vm1029_vm9, %v1024_v45 }
0x1563   :  { %v1173_v47 = vpop.permute.xlu1 %1172 }
0x1564   :  { %v431_v4 = vpop.permute.xlu0 %430  ;;  %1179 = vst.msk [vmem:[#allocation2] sm:$0x40] %vm1178_vm10, %v1173_v47 }
0x1565   :  { %436 = vst.msk [vmem:[#allocation2 + $0x8] sm:$0x2] %vm434_vm5, %v431_v4 }
0x1567   :  { %v283_v6 = vpop.permute.xlu1 %282 }
0x1568   :  { %v728_v0 = vpop.permute.xlu0 %727  ;;  %288 = vst.msk [vmem:[#allocation2 + $0x8] sm:$0x1] %vm286_vm4, %v283_v6 }
0x1569   :  { %733 = vst.msk [vmem:[#allocation2 + $0x8] sm:$0x8] %vm731_vm7, %v728_v0 }
0x156b   :  { %v579_v9 = vpop.permute.xlu1 %578 }
0x156c   :  { %v1026_v48 = vpop.permute.xlu0 %1025  ;;  %584 = vst.msk [vmem:[#allocation2 + $0x8] sm:$0x4] %vm582_vm6, %v579_v9 }
0x156d   :  { %1031 = vst.msk [vmem:[#allocation2 + $0x8] sm:$0x20] %vm1029_vm9, %v1026_v48 }
0x156f   :  { %v877_v52 = vpop.permute.xlu1 %876 }
0x1570   :  { %882 = vst.msk [vmem:[#allocation2 + $0x8] sm:$0x10] %vm880_vm8, %v877_v52 }
0x1573   :  { %v1175_v53 = vpop.permute.xlu1 %1174 }
0x1574   :  { %1180 = vst.msk [vmem:[#allocation2 + $0x8] sm:$0x40] %vm1178_vm10, %v1175_v53 }
0x15c8   :  { %v1322_v54 = vpop.permute.xlu0 %1321 }
0x15c9   :  { %1328 = vst.msk [vmem:[#allocation2] sm:$0x80] %vm1327_vm11, %v1322_v54  ;;  %1334 = vst.msk [vmem:[%s2199_s9 - $0x7] sm:$0x80] %vm1327_vm11, %v1322_v54 }
0x15cb   :  { %v1332_v55 = vpop.permute.xlu1 %1331 }
0x15cc   :  { %1335 = vst.msk [vmem:[%s2199_s9 + $0x1] sm:$0x1] %vm286_vm4, %v1332_v55  ;;  %v1324_v56 = vpop.permute.xlu0 %1323 }
0x15cd   :  { %1329 = vst.msk [vmem:[#allocation2 + $0x8] sm:$0x80] %vm1327_vm11, %v1324_v56 }
0x15cf   :  { %v1342_v57 = vpop.permute.xlu1 %1341 }
0x15d0   :  { %1346 = vst.msk [vmem:[%s2200_s10 + $0x1] sm:$0x1] %vm286_vm4, %v1342_v57  ;;  %v1340_v58 = vpop.permute.xlu0 %1339  ;;  %v1347_v59 = vld [vmem:[#allocation2] sm:$0xff] }
0x15d1   :  { %1345 = vst.msk [vmem:[%s2200_s10 - $0x7] sm:$0x80] %vm1327_vm11, %v1340_v58  ;;  %1636 = vmatprep.mubr.msk.f32.mxu1 %vm142_vm2, %v1347_v59 }
0x15d4   :  { %v1348_v60 = vld [vmem:[#allocation2 + $0x8] sm:$0xff] }
0x15d5   :  { %1637 = vmatmul.mubr.msk.f32.vlgmr.msra.gmra.mxu1 %vm142_vm2, %v1348_v60 }
0x1695   :  { %v1638_v62 = vpop.f32.mrf.mxu1 }
0x1696   :  { %v1438_v63 = vadd.f32 %v1638_v62, %v1483_v61 }
0x1697   :  { %v1432_v2 = vpop.f32.mrf.mxu1 }
0x1698   :  { %1442 = vst.msk [vmem:[%s2198_s8 + $0x8] sm:$0xff] %vm54_vm1, %v1438_v63  ;;  %v1433_v7 = vadd.f32 %v1483_v61, %v1432_v2 }
0x169a   :  { %1441 = vst.msk [vmem:[%s2198_s8] sm:$0xff] %vm54_vm1, %v1433_v7 }
0x169b   :  { %1455 = vsyncpa [#allocation4], 1 }

</bundles_post_ra>
